<compile_context>
chip_gen: v7x
topology: tpu7x:2x2x1
jax: 0.10.0
libtpu: 0.0.40
codegen_flags: <defaults>
</compile_context>

<pallas_src>
import jax
import jax.numpy as jnp
from jax.experimental import pallas as pl
from jax.experimental.pallas import tpu as pltpu

OUT_PAD = 8  # pad the 5 output features to one sublane (full-array last dim)


def fused_mlp_kernel(x_ref, w_ref, b_ref, o_ref):
    # One MXU pass per batch tile: [tb, 30] @ [30, 8] + [1, 8]
    y = jnp.dot(x_ref[...], w_ref[...], preferred_element_type=jnp.float32)
    o_ref[...] = (y + b_ref[...]).astype(o_ref.dtype)


def fuse_mlp_params(w1, b1, w2, b2, w3, b3):
    """Collapse the activation-free Linear chain into one (W, b), padded to 8 cols.

    Call once per parameter set (hoisted out of the per-forward path).
    Weights are [in_features, out_features]; biases [1, out_features].
    """
    w_f = w1 @ w2 @ w3                    # [30, 5]
    b_f = b1 @ w2 @ w3 + b2 @ w3 + b3     # [1, 5]
    n_out = w_f.shape[1]
    w_p = jnp.zeros((w_f.shape[0], OUT_PAD), w_f.dtype).at[:, :n_out].set(w_f)
    b_p = jnp.zeros((1, OUT_PAD), b_f.dtype).at[:, :n_out].set(b_f)
    return w_p, b_p, n_out


def _round_up(v, m):
    return ((v + m - 1) // m) * m


def mlp_forward_fused(x, w_p, b_p, n_out, *, tile_b=4096):
    """Forward pass using pre-fused, pre-padded parameters."""
    B, K = x.shape
    n_pad = w_p.shape[1]

    # Grid sizing: at least cdiv(B, tile_b) steps; force >=2 steps once B is
    # big enough so the "parallel" grid axis feeds both v7x TensorCores.
    n_tiles = pl.cdiv(B, tile_b)
    if B >= 16:
        n_tiles = max(n_tiles, 2)
    # Spread rows evenly across tiles (multiple of 8) instead of padding a
    # whole extra tile when B is ragged.
    tb = _round_up(pl.cdiv(B, n_tiles), 8)
    b_pad = n_tiles * tb
    x_p = x if b_pad == B else jnp.pad(x, ((0, b_pad - B), (0, 0)))

    out = pl.pallas_call(
        fused_mlp_kernel,
        out_shape=jax.ShapeDtypeStruct((b_pad, n_pad), x.dtype),
        grid=(n_tiles,),
        in_specs=[
            pl.BlockSpec((tb, K), lambda i: (i, 0)),      # x tile, pipelined
            pl.BlockSpec((K, n_pad), lambda i: (0, 0)),   # fused W, resident
            pl.BlockSpec((1, n_pad), lambda i: (0, 0)),   # fused b, resident
        ],
        out_specs=pl.BlockSpec((tb, n_pad), lambda i: (i, 0)),
        compiler_params=pltpu.CompilerParams(
            dimension_semantics=("parallel",)),            # megacore sharding
    )(x_p, w_p, b_p)

    return out[:B, :n_out]


def mlp_forward(x, w1, b1, w2, b2, w3, b3, *, tile_b=4096):
    """Convenience wrapper matching torch: fc3(fc2(fc1(x)))."""
    w_p, b_p, n_out = fuse_mlp_params(w1, b1, w2, b2, w3, b3)
    return mlp_forward_fused(x, w_p, b_p, n_out, tile_b=tile_b)


def init_linear(key, fan_in, fan_out, dtype=jnp.float32):
    # Deterministic init mimicking torch.nn.Linear (uniform +/- 1/sqrt(fan_in)).
    kw, kb = jax.random.split(key)
    bound = 1.0 / jnp.sqrt(jnp.array(fan_in, dtype))
    w = jax.random.uniform(kw, (fan_in, fan_out), dtype, -bound, bound)
    b = jax.random.uniform(kb, (1, fan_out), dtype, -bound, bound)
    return w, b


def reference(x, w1, b1, w2, b2, w3, b3):
    # Plain-JAX reference of the original (unfused) torch forward pass.
    return ((x @ w1 + b1) @ w2 + b2) @ w3 + b3


if __name__ == "__main__":
    key = jax.random.PRNGKey(0)
    kx, k1, k2, k3, kx2 = jax.random.split(key, 5)

    w1, b1 = init_linear(k1, 30, 40)
    w2, b2 = init_linear(k2, 40, 30)
    w3, b3 = init_linear(k3, 30, 5)

    # Fuse the parameters once (hoisted out of the per-call path).
    w_p, b_p, n_out = fuse_mlp_params(w1, b1, w2, b2, w3, b3)

    # Small batch (matches the module's 30-feature input).
    B = 8
    x = jax.random.normal(kx, (B, 30), jnp.float32)
    out = jax.block_until_ready(mlp_forward_fused(x, w_p, b_p, n_out))
    ref = reference(x, w1, b1, w2, b2, w3, b3)
    assert out.shape == (B, 5)
    assert jnp.allclose(out, ref, atol=1e-4, rtol=1e-4), float(
        jnp.max(jnp.abs(out - ref)))

    # Ragged batch: exercises the >=2-tile grid + even remainder spreading
    # (600 rows -> 2 tiles of 304 rows, only 8 padded rows).
    B2 = 600
    x2 = jax.random.normal(kx2, (B2, 30), jnp.float32)
    out2 = jax.block_until_ready(mlp_forward_fused(x2, w_p, b_p, n_out))
    ref2 = reference(x2, w1, b1, w2, b2, w3, b3)
    assert out2.shape == (B2, 5)
    assert jnp.allclose(out2, ref2, atol=1e-4, rtol=1e-4), float(
        jnp.max(jnp.abs(out2 - ref2)))

    print("KERNEL_OK")
</pallas_src>

<mosaic_0001>
module attributes {stable_mosaic.version = 11 : i64} {
  func.func @fused_mlp_kernel(%arg0: i32, %arg1: memref<8x30xf32, #tpu.memory_space<vmem>>, %arg2: memref<30x8xf32, #tpu.memory_space<vmem>>, %arg3: memref<1x8xf32, #tpu.memory_space<vmem>>, %arg4: memref<8x8xf32, #tpu.memory_space<vmem>>) attributes {dimension_semantics = [#tpu.dimension_semantics<parallel>], iteration_bounds = array<i64: 1>, scalar_prefetch = 0 : i64, scratch_operands = 0 : i64, tpu.core_type = #tpu.core_type<tc>, window_params = [{transform_indices = @transform_0, window_bounds = array<i64: 8, 30>}, {pipeline_mode = #tpu.pipeline_mode<synchronous>, transform_indices = @transform_1, window_bounds = array<i64: 30, 8>}, {pipeline_mode = #tpu.pipeline_mode<synchronous>, transform_indices = @transform_2, window_bounds = array<i64: 1, 8>}, {transform_indices = @transform_3, window_bounds = array<i64: 8, 8>}]} {
    %c0 = arith.constant 0 : index
    %c0_0 = arith.constant 0 : index
    %0 = vector.load %arg1[%c0, %c0_0] : memref<8x30xf32, #tpu.memory_space<vmem>>, vector<8x30xf32>
    %c0_1 = arith.constant 0 : index
    %c0_2 = arith.constant 0 : index
    %1 = vector.load %arg2[%c0_1, %c0_2] : memref<30x8xf32, #tpu.memory_space<vmem>>, vector<30x8xf32>
    %cst = arith.constant dense<0.000000e+00> : vector<8x8xf32>
    %2 = tpu.matmul %0, %1, %cst {dimension_numbers = #tpu.dot_dimension_numbers<[1], [0], [0], [1], [0, 0, 1, 1], [], []>} : vector<8x30xf32>, vector<30x8xf32>, vector<8x8xf32> -> vector<8x8xf32>
    %c0_3 = arith.constant 0 : index
    %c0_4 = arith.constant 0 : index
    %3 = vector.load %arg3[%c0_3, %c0_4] : memref<1x8xf32, #tpu.memory_space<vmem>>, vector<1x8xf32>
    %4 = vector.broadcast %3 : vector<1x8xf32> to vector<8x8xf32>
    %5 = arith.addf %2, %4 : vector<8x8xf32>
    %c0_5 = arith.constant 0 : index
    %c0_6 = arith.constant 0 : index
    %6 = vector.load %arg4[%c0_5, %c0_6] : memref<8x8xf32, #tpu.memory_space<vmem>>, vector<8x8xf32>
    tpu.vector_store %arg4[%c0_5, %c0_6], %5 {strides = array<i32>} : memref<8x8xf32, #tpu.memory_space<vmem>>, vector<8x8xf32>,
    return
  }
  func.func @transform_0(%arg0: i32) -> (i32, i32) {
    %c0_i32 = arith.constant 0 : i32
    %c0_i32_0 = arith.constant 0 : i32
    return %arg0, %c0_i32 : i32, i32
  }
  func.func @transform_1(%arg0: i32) -> (i32, i32) {
    %c0_i32 = arith.constant 0 : i32
    %c0_i32_0 = arith.constant 0 : i32
    %c0_i32_1 = arith.constant 0 : i32
    return %c0_i32, %c0_i32_0 : i32, i32
  }
  func.func @transform_2(%arg0: i32) -> (i32, i32) {
    %c0_i32 = arith.constant 0 : i32
    %c0_i32_0 = arith.constant 0 : i32
    %c0_i32_1 = arith.constant 0 : i32
    return %c0_i32, %c0_i32_0 : i32, i32
  }
  func.func @transform_3(%arg0: i32) -> (i32, i32) {
    %c0_i32 = arith.constant 0 : i32
    %c0_i32_0 = arith.constant 0 : i32
    return %arg0, %c0_i32 : i32, i32
  }
}

</mosaic_0001>

<bundles_post_ra>
// kernel: tpu_custom_call.1
= control target key start
LH: loop header
LB: loop body
LE: loop exit
PB: predicated region body
PF: predicated region fallthrough
CT: control target
= control target key end

     0   :  { %vm31_vm0 = vcmask 1045504   ;;  %v176_v3 = vmov 0.0|0.0   ;;  %vm177_vm1 = vmmov 0   ;;  %v178_v6 = vmov 0.0   ;;  %s231_s0 = inlined_call_operand.vmem [shape: f32[8,30], index: 0, kind: input, shape index: {}]   ;;  %s232_s1 = inlined_call_operand.vmem [shape: f32[30,8], index: 1, kind: input, shape index: {}]   ;;  %s233_s2 = inlined_call_operand.vmem [shape: f32[1,8], index: 2, kind: input, shape index: {}]   ;;  %s234_s3 = inlined_call_operand.hbm [shape: f32[8,8], index: 3, kind: output, shape index: {}]  }
   0x1   :  { %v16_v0 = vld [vmem:[%s232_s1] sm:$0xff]  ;;  %v17_v1 = vld [vmem:[%s232_s1 + $0x8] sm:$0xff]  ;;  %v18_v2 = vld [vmem:[%s232_s1 + $0x10] sm:$0xff]  ;;  %140 = vmatprep.subr.bf16.mxu0 %v176_v3  ;;  %137 = vmatprep.mubr.msk.f32.mxu0 %vm177_vm1, %v178_v6 }
   0x2   :  { %v141_v4 = vpack.c.bf16 %v17_v1, %v16_v0  ;;  %v19_v5 = vld [vmem:[%s232_s1 + $0x18] sm:$0x3f] }
   0x3   :  { %8 = vsyncpa [#allocation3], 0  ;;  %v144_v7 = vpack.c.bf16 %v19_v5, %v18_v2  ;;  %vm179_vm2 = vmmov 1   ;;  %v15_v8 = vld [vmem:[%s231_s0] sm:$0xff]  ;;  %vm27_vm4 = vcmask 244736   ;;  %s180_s1 = smov [#allocation2]  }
   0x4   :  { %142 = vmatpush3.bf16.msra.mxu0 %v141_v4  ;;  %vm145_vm3 = vmpackc.low %vm31_vm0, %vm179_vm2  ;;  %v121_v9 = vld [vmem:[%s233_s2] ss:$0 sm:$0xff]  ;;  %s113_s24 = sshll.u32 %s180_s1, 4  ;;  %vm105_vm5 = vcmask 64512   ;;  %s114_s24 = int_to_ptr.vmem [resolvable:$true] %s113_s24 }
   0x5   :  { %143 = vmatprep.subr.bf16.mxu0 %v176_v3  ;;  %s152_s25 = scalar_lea.vmem %s114_s24, 128  ;;  %p157_p1 = scmp.lt.s32.totalorder %s114_s24, %s114_s24 }
   0x6   :  { %p153_p0 = scmp.ne.s32.totalorder %s114_s24, %s152_s25  ;;  %p158_p2 = scmp.lt.s32.totalorder %s152_s25, %s152_s25 }
   0x8   :  { %146 = vmatpush3.bf16.msk.msra.mxu0 %vm145_vm3, %v144_v7  ;;  %p159_p3 = por %p158_p2, %p157_p1 }
   0xa   :  { %p160_p4 = pnand %p159_p3, %p153_p0 }
   0xb   :  { %138 = vmatmul.mubr.msk.f32.vlgmr.msra.gmra.mrb[0].mxu0 %vm27_vm4, %v15_v8 }
  0xde   :  { %v101_v10 = vpop.f32.mrb[0].mxu0 }
  0xdf   :  { %v102_v11 = vadd.f32 %v121_v9, %v101_v10  ;;  %v139_v12 = vpop.f32.mrb[1].mxu0 }
  0xe1   :  { %106 = vst.msk [vmem:[#allocation2] sm:$0xff] %vm105_vm5, %v102_v11 }
  0xe2   :  { %163 = shalt.err (!%p160_p4)
}
  0xe3   :  { %s164_s27 = scalar_lea.hbm %s234_s3, 128 }
  0xe4   :  { %p165_p5 = scmp.ne.s32.totalorder %s234_s3, %s164_s27  ;;  %p168_p6 = scmp.lt.u32.totalorder %s164_s27, %s234_s3 }
  0xe6   :  { %p170_p7 = pnand %p168_p6, %p165_p5 }
  0xe8   :  { %173 = shalt.err (!%p170_p7)
}
  0xe9   :  { %116 = dma.vmem_to_hbm [thread:$0]  %s114_s24, 128, %s234_s3, [#allocation3]  }
  0xea   :  { %174 = dma.done.wait [#allocation3], 128  }
  0xeb   :  { %175 = vsyncadd [#allocation3], 4294967168 }
  0xec   :  { %120 = vsyncpa [#allocation3], 1 }

</bundles_post_ra>
